<compile_context>
chip_gen: v5e
topology: v5e:2x2
jax: 0.10.0
libtpu: 0.0.40
codegen_flags: <defaults>
</compile_context>

<pallas_src>
import functools

import jax
import jax.numpy as jnp
from jax.experimental import pallas as pl
from jax.experimental.pallas import tpu as pltpu


_LANE = 128

# Packed-parameter offsets (weights stored row-major as (in_features, out_features)).
_W1, _B1 = 0, 2        # Linear(1, 2):  2 weights + 2 biases
_W2, _B2 = 4, 12       # Linear(2, 4):  8 weights + 4 biases
_W3, _B3 = 16, 48      # Linear(4, 8): 32 weights + 8 biases
_N_PARAMS = 56


def xlgen_kernel(p_ref, x_ref, o_ref):
    """Fused 3-layer MLP forward over one batch tile.

    p_ref : SMEM (56,)            tanh-folded weights/biases (scalars)
    x_ref : VMEM (TR, 128)        latent scalars, batch on (sublane, lane)
    o_ref : VMEM (8, TR, 128)     feature-major output tile (lane-dense stores)

    All contractions are K in {1,2,4}: scalar-broadcast FMAs on the VPU (no MXU).
    tanh goes to the EUP (its own bundle slot), so the VALU stays the binding
    unit at ~100 vector ops per (8,128) strip.
    """
    x = x_ref[...]                                                    # (TR, 128)

    # Layer 1: 1 -> 2.  t1_j = tanh(0.5*w1_j*x + 0.5*b1_j)  (folding in pack_params)
    t1 = [jnp.tanh(p_ref[_W1 + j] * x + p_ref[_B1 + j]) for j in range(2)]

    # Layer 2: 2 -> 4.
    t2 = []
    for j in range(4):
        acc = p_ref[_W2 + 0 * 4 + j] * t1[0] + p_ref[_B2 + j]
        acc = acc + p_ref[_W2 + 1 * 4 + j] * t1[1]
        t2.append(jnp.tanh(acc))

    # Layer 3: 4 -> 8, stored feature-major so each store is a full lane-dense tile.
    # Only here does the sigmoid's 0.5*t + 0.5 epilogue survive (it has no "next
    # layer" to fold into).
    for j in range(8):
        acc = p_ref[_W3 + 0 * 8 + j] * t2[0] + p_ref[_B3 + j]
        for k in range(1, 4):
            acc = acc + p_ref[_W3 + k * 8 + j] * t2[k]
        o_ref[j, :, :] = 0.5 * jnp.tanh(acc) + 0.5


def init_params(key):
    """PyTorch-style init: U(-1/sqrt(fan_in), +1/sqrt(fan_in)).

    Weights are stored as (in_features, out_features) — already transposed
    relative to torch's (out, in) — so y = x @ W + b.
    """
    dims = [(1, 2), (2, 4), (4, 8)]
    params = []
    for fan_in, fan_out in dims:
        key, kw, kb = jax.random.split(key, 3)
        bound = 1.0 / jnp.sqrt(jnp.float32(fan_in))
        w = jax.random.uniform(kw, (fan_in, fan_out), jnp.float32, -bound, bound)
        b = jax.random.uniform(kb, (fan_out,), jnp.float32, -bound, bound)
        params.append((w, b))
    return params


def pack_params(params):
    """Flatten weights/biases into one (56,) fp32 SMEM operand, tanh-folded.

    With sigmoid(z) = 0.5 + 0.5*tanh(z/2):
      layer 1:  t1 = tanh(x @ (0.5*W1) + 0.5*b1),            h1 = 0.5 + 0.5*t1
      layer 2:  z2/2 = t1 @ (0.25*W2) + (0.25*sum_k W2[k,:] + 0.5*b2)
      layer 3:  z3/2 = t2 @ (0.25*W3) + (0.25*sum_k W3[k,:] + 0.5*b3)
      output :  y  = 0.5 + 0.5*tanh(z3/2)
    so the kernel only ever evaluates bare tanh plus one final affine.
    """
    (w1, b1), (w2, b2), (w3, b3) = params
    w1p = 0.5 * w1
    b1p = 0.5 * b1
    w2p = 0.25 * w2
    b2p = 0.25 * jnp.sum(w2, axis=0) + 0.5 * b2
    w3p = 0.25 * w3
    b3p = 0.25 * jnp.sum(w3, axis=0) + 0.5 * b3
    packed = jnp.concatenate([
        w1p.reshape(-1), b1p.reshape(-1),      # 2 + 2
        w2p.reshape(-1), b2p.reshape(-1),      # 8 + 4
        w3p.reshape(-1), b3p.reshape(-1),      # 32 + 8
    ]).astype(jnp.float32)
    assert packed.shape == (_N_PARAMS,)
    return packed


def _xlgen_forward_impl(x, packed_params, *, tile_rows=512, feature_major=False):
    """x: (B, 1) or (B,) float -> (B, 8) float32 (or (8, B) if feature_major).

    tile_rows * 128 batch elements per grid step (tile_rows multiple of 8).
    Default 512 rows = 64K elements/step (~2.3 MiB moved per step) keeps each
    step well past the ~0.35 µs fixed pipeline overhead while staying far under
    VMEM limits on all generations (incl. v7x's 64 MiB).
    """
    x = jnp.asarray(x, jnp.float32)
    if x.ndim == 2:
        assert x.shape[-1] == 1, "XLGen expects in_features == 1"
    x = x.reshape(-1)
    B = x.shape[0]

    # --- tile-size selection (static: B is a shape) ---
    tile_rows = max(8, (int(tile_rows) // 8) * 8)
    rows_needed = pl.cdiv(B, _LANE)
    rows_padded8 = max(8, pl.cdiv(rows_needed, 8) * 8)
    if rows_padded8 >= 16:
        # Cap at ~half the batch so the grid has >= 2 steps and the "parallel"
        # batch axis can shard across both TensorCores on v7x.
        cap = max(8, pl.cdiv(rows_padded8, 16) * 8)
    else:
        cap = 8
    tile_rows = min(tile_rows, cap)

    tile_b = tile_rows * _LANE
    n_tiles = pl.cdiv(B, tile_b)
    padded_b = n_tiles * tile_b
    if padded_b != B:
        x = jnp.pad(x, (0, padded_b - B))          # zero padding; sliced off below
    rows = padded_b // _LANE
    x2 = x.reshape(rows, _LANE)

    # Double-buffered block footprint; raise scoped VMEM (mainly for v5e's
    # 16 MiB default) when big tiles are requested, with headroom left over.
    dbuf_bytes = 2 * (8 * tile_rows * _LANE * 4 + tile_rows * _LANE * 4)
    vmem_limit = int(min(60 * 1024 * 1024, max(32 * 1024 * 1024, 4 * dbuf_bytes)))

    out = pl.pallas_call(
        xlgen_kernel,
        out_shape=jax.ShapeDtypeStruct((8, rows, _LANE), jnp.float32),
        grid=(n_tiles,),
        in_specs=[
            # All 56 parameters as one packed SMEM operand (scalar reads in-kernel).
            pl.BlockSpec(memory_space=pltpu.MemorySpace.SMEM),
            # Batch tile of latent scalars, auto double-buffered.
            pl.BlockSpec((tile_rows, _LANE), lambda i: (i, 0)),
        ],
        out_specs=pl.BlockSpec((8, tile_rows, _LANE), lambda i: (0, i, 0)),
        compiler_params=pltpu.CompilerParams(
            dimension_semantics=("parallel",),     # shard batch grid across TCs (v7x)
            vmem_limit_bytes=vmem_limit,
        ),
    )(packed_params, x2)

    out = out.reshape(8, padded_b)
    if feature_major:
        # Kernel-native layout: no HBM transpose at all.
        return out[:, :B]
    # PyTorch (B, 8) convention: under jit, XLA fuses this transpose with the
    # slice (layout plumbing stays outside the kernel).
    return out.T[:B]


# jit the whole wrapper so pad / reshape / transpose / slice fuse with the call.
xlgen_forward = jax.jit(_xlgen_forward_impl,
                        static_argnames=("tile_rows", "feature_major"))


def xlgen_forward_ref(x, params):
    """Pure-JAX reference (raw, unfolded params) for correctness checking."""
    h = jnp.asarray(x, jnp.float32).reshape(-1, 1)
    for w, b in params:
        h = jax.nn.sigmoid(h @ w + b)
    return h


if __name__ == "__main__":
    key = jax.random.PRNGKey(0)
    kp, kx = jax.random.split(key)

    params = init_params(kp)
    packed = pack_params(params)

    # Small demo batch of scalar latents (Linear(1, ...) => in_features = 1).
    # B = 2000 is not a multiple of the 1024-element tile (exercises padding)
    # and the tile clamp yields a 2-step grid (exercises the parallel batch axis).
    B = 2000
    x = jax.random.normal(kx, (B, 1), dtype=jnp.float32)

    y = xlgen_forward(x, packed)
    y = jax.block_until_ready(y)

    y_ref = xlgen_forward_ref(x, params)
    assert y.shape == (B, 8)
    assert bool(jnp.all(jnp.isfinite(y)))
    # Exact tanh-form sigmoid: only EUP tanh / fp32 rounding differences remain.
    max_err = float(jnp.max(jnp.abs(y - y_ref)))
    assert max_err < 1e-4, f"max abs error {max_err}"

    print("KERNEL_OK")
</pallas_src>

<mosaic_0001>
module attributes {stable_mosaic.version = 11 : i64} {
  func.func @xlgen_kernel(%arg0: i32, %arg1: memref<56xf32, #tpu.memory_space<smem>>, %arg2: memref<8x128xf32, #tpu.memory_space<vmem>>, %arg3: memref<8x8x128xf32, #tpu.memory_space<vmem>>) attributes {dimension_semantics = [#tpu.dimension_semantics<parallel>], iteration_bounds = array<i64: 2>, scalar_prefetch = 0 : i64, scratch_operands = 0 : i64, tpu.core_type = #tpu.core_type<tc>, window_params = [{transform_indices = @transform_0, window_bounds = array<i64: 56>}, {transform_indices = @transform_1, window_bounds = array<i64: 8, 128>}, {transform_indices = @transform_2, window_bounds = array<i64: 8, 8, 128>}]} {
    %c0 = arith.constant 0 : index
    %c0_0 = arith.constant 0 : index
    %0 = vector.load %arg2[%c0, %c0_0] : memref<8x128xf32, #tpu.memory_space<vmem>>, vector<8x128xf32>
    %c0_1 = arith.constant 0 : index
    %1 = memref.load %arg1[%c0_1] : memref<56xf32, #tpu.memory_space<smem>>
    %2 = vector.broadcast %1 : f32 to vector<8x128xf32>
    %3 = arith.mulf %2, %0 : vector<8x128xf32>
    %c2 = arith.constant 2 : index
    %4 = memref.load %arg1[%c2] : memref<56xf32, #tpu.memory_space<smem>>
    %5 = vector.broadcast %4 : f32 to vector<8x128xf32>
    %6 = arith.addf %3, %5 : vector<8x128xf32>
    %7 = math.tanh %6 : vector<8x128xf32>
    %c1 = arith.constant 1 : index
    %8 = memref.load %arg1[%c1] : memref<56xf32, #tpu.memory_space<smem>>
    %9 = vector.broadcast %8 : f32 to vector<8x128xf32>
    %10 = arith.mulf %9, %0 : vector<8x128xf32>
    %c3 = arith.constant 3 : index
    %11 = memref.load %arg1[%c3] : memref<56xf32, #tpu.memory_space<smem>>
    %12 = vector.broadcast %11 : f32 to vector<8x128xf32>
    %13 = arith.addf %10, %12 : vector<8x128xf32>
    %14 = math.tanh %13 : vector<8x128xf32>
    %c4 = arith.constant 4 : index
    %15 = memref.load %arg1[%c4] : memref<56xf32, #tpu.memory_space<smem>>
    %16 = vector.broadcast %15 : f32 to vector<8x128xf32>
    %17 = arith.mulf %16, %7 : vector<8x128xf32>
    %c12 = arith.constant 12 : index
    %18 = memref.load %arg1[%c12] : memref<56xf32, #tpu.memory_space<smem>>
    %19 = vector.broadcast %18 : f32 to vector<8x128xf32>
    %20 = arith.addf %17, %19 : vector<8x128xf32>
    %c8 = arith.constant 8 : index
    %21 = memref.load %arg1[%c8] : memref<56xf32, #tpu.memory_space<smem>>
    %22 = vector.broadcast %21 : f32 to vector<8x128xf32>
    %23 = arith.mulf %22, %14 : vector<8x128xf32>
    %24 = arith.addf %20, %23 : vector<8x128xf32>
    %25 = math.tanh %24 : vector<8x128xf32>
    %c5 = arith.constant 5 : index
    %26 = memref.load %arg1[%c5] : memref<56xf32, #tpu.memory_space<smem>>
    %27 = vector.broadcast %26 : f32 to vector<8x128xf32>
    %28 = arith.mulf %27, %7 : vector<8x128xf32>
    %c13 = arith.constant 13 : index
    %29 = memref.load %arg1[%c13] : memref<56xf32, #tpu.memory_space<smem>>
    %30 = vector.broadcast %29 : f32 to vector<8x128xf32>
    %31 = arith.addf %28, %30 : vector<8x128xf32>
    %c9 = arith.constant 9 : index
    %32 = memref.load %arg1[%c9] : memref<56xf32, #tpu.memory_space<smem>>
    %33 = vector.broadcast %32 : f32 to vector<8x128xf32>
    %34 = arith.mulf %33, %14 : vector<8x128xf32>
    %35 = arith.addf %31, %34 : vector<8x128xf32>
    %36 = math.tanh %35 : vector<8x128xf32>
    %c6 = arith.constant 6 : index
    %37 = memref.load %arg1[%c6] : memref<56xf32, #tpu.memory_space<smem>>
    %38 = vector.broadcast %37 : f32 to vector<8x128xf32>
    %39 = arith.mulf %38, %7 : vector<8x128xf32>
    %c14 = arith.constant 14 : index
    %40 = memref.load %arg1[%c14] : memref<56xf32, #tpu.memory_space<smem>>
    %41 = vector.broadcast %40 : f32 to vector<8x128xf32>
    %42 = arith.addf %39, %41 : vector<8x128xf32>
    %c10 = arith.constant 10 : index
    %43 = memref.load %arg1[%c10] : memref<56xf32, #tpu.memory_space<smem>>
    %44 = vector.broadcast %43 : f32 to vector<8x128xf32>
    %45 = arith.mulf %44, %14 : vector<8x128xf32>
    %46 = arith.addf %42, %45 : vector<8x128xf32>
    %47 = math.tanh %46 : vector<8x128xf32>
    %c7 = arith.constant 7 : index
    %48 = memref.load %arg1[%c7] : memref<56xf32, #tpu.memory_space<smem>>
    %49 = vector.broadcast %48 : f32 to vector<8x128xf32>
    %50 = arith.mulf %49, %7 : vector<8x128xf32>
    %c15 = arith.constant 15 : index
    %51 = memref.load %arg1[%c15] : memref<56xf32, #tpu.memory_space<smem>>
    %52 = vector.broadcast %51 : f32 to vector<8x128xf32>
    %53 = arith.addf %50, %52 : vector<8x128xf32>
    %c11 = arith.constant 11 : index
    %54 = memref.load %arg1[%c11] : memref<56xf32, #tpu.memory_space<smem>>
    %55 = vector.broadcast %54 : f32 to vector<8x128xf32>
    %56 = arith.mulf %55, %14 : vector<8x128xf32>
    %57 = arith.addf %53, %56 : vector<8x128xf32>
    %58 = math.tanh %57 : vector<8x128xf32>
    %c16 = arith.constant 16 : index
    %59 = memref.load %arg1[%c16] : memref<56xf32, #tpu.memory_space<smem>>
    %60 = vector.broadcast %59 : f32 to vector<8x128xf32>
    %61 = arith.mulf %60, %25 : vector<8x128xf32>
    %c48 = arith.constant 48 : index
    %62 = memref.load %arg1[%c48] : memref<56xf32, #tpu.memory_space<smem>>
    %63 = vector.broadcast %62 : f32 to vector<8x128xf32>
    %64 = arith.addf %61, %63 : vector<8x128xf32>
    %c24 = arith.constant 24 : index
    %65 = memref.load %arg1[%c24] : memref<56xf32, #tpu.memory_space<smem>>
    %66 = vector.broadcast %65 : f32 to vector<8x128xf32>
    %67 = arith.mulf %66, %36 : vector<8x128xf32>
    %68 = arith.addf %64, %67 : vector<8x128xf32>
    %c32 = arith.constant 32 : index
    %69 = memref.load %arg1[%c32] : memref<56xf32, #tpu.memory_space<smem>>
    %70 = vector.broadcast %69 : f32 to vector<8x128xf32>
    %71 = arith.mulf %70, %47 : vector<8x128xf32>
    %72 = arith.addf %68, %71 : vector<8x128xf32>
    %c40 = arith.constant 40 : index
    %73 = memref.load %arg1[%c40] : memref<56xf32, #tpu.memory_space<smem>>
    %74 = vector.broadcast %73 : f32 to vector<8x128xf32>
    %75 = arith.mulf %74, %58 : vector<8x128xf32>
    %76 = arith.addf %72, %75 : vector<8x128xf32>
    %77 = math.tanh %76 : vector<8x128xf32>
    %cst = arith.constant 5.000000e-01 : f32
    %78 = vector.broadcast %cst : f32 to vector<8x128xf32>
    %79 = arith.mulf %78, %77 : vector<8x128xf32>
    %cst_2 = arith.constant 5.000000e-01 : f32
    %80 = vector.broadcast %cst_2 : f32 to vector<8x128xf32>
    %81 = arith.addf %79, %80 : vector<8x128xf32>
    %c0_3 = arith.constant 0 : index
    %c0_4 = arith.constant 0 : index
    %c0_5 = arith.constant 0 : index
    %82 = vector.load %arg3[%c0_3, %c0_4, %c0_5] : memref<8x8x128xf32, #tpu.memory_space<vmem>>, vector<1x8x128xf32>
    %83 = vector.shape_cast %82 : vector<1x8x128xf32> to vector<8x128xf32>
    %84 = vector.shape_cast %81 : vector<8x128xf32> to vector<1x8x128xf32>
    tpu.vector_store %arg3[%c0_3, %c0_4, %c0_5], %84 {strides = array<i32>} : memref<8x8x128xf32, #tpu.memory_space<vmem>>, vector<1x8x128xf32>,
    %c17 = arith.constant 17 : index
    %85 = memref.load %arg1[%c17] : memref<56xf32, #tpu.memory_space<smem>>
    %86 = vector.broadcast %85 : f32 to vector<8x128xf32>
    %87 = arith.mulf %86, %25 : vector<8x128xf32>
    %c49 = arith.constant 49 : index
    %88 = memref.load %arg1[%c49] : memref<56xf32, #tpu.memory_space<smem>>
    %89 = vector.broadcast %88 : f32 to vector<8x128xf32>
    %90 = arith.addf %87, %89 : vector<8x128xf32>
    %c25 = arith.constant 25 : index
    %91 = memref.load %arg1[%c25] : memref<56xf32, #tpu.memory_space<smem>>
    %92 = vector.broadcast %91 : f32 to vector<8x128xf32>
    %93 = arith.mulf %92, %36 : vector<8x128xf32>
    %94 = arith.addf %90, %93 : vector<8x128xf32>
    %c33 = arith.constant 33 : index
    %95 = memref.load %arg1[%c33] : memref<56xf32, #tpu.memory_space<smem>>
    %96 = vector.broadcast %95 : f32 to vector<8x128xf32>
    %97 = arith.mulf %96, %47 : vector<8x128xf32>
    %98 = arith.addf %94, %97 : vector<8x128xf32>
    %c41 = arith.constant 41 : index
    %99 = memref.load %arg1[%c41] : memref<56xf32, #tpu.memory_space<smem>>
    %100 = vector.broadcast %99 : f32 to vector<8x128xf32>
    %101 = arith.mulf %100, %58 : vector<8x128xf32>
    %102 = arith.addf %98, %101 : vector<8x128xf32>
    %103 = math.tanh %102 : vector<8x128xf32>
    %cst_6 = arith.constant 5.000000e-01 : f32
    %104 = vector.broadcast %cst_6 : f32 to vector<8x128xf32>
    %105 = arith.mulf %104, %103 : vector<8x128xf32>
    %cst_7 = arith.constant 5.000000e-01 : f32
    %106 = vector.broadcast %cst_7 : f32 to vector<8x128xf32>
    %107 = arith.addf %105, %106 : vector<8x128xf32>
    %c1_8 = arith.constant 1 : index
    %c0_9 = arith.constant 0 : index
    %c0_10 = arith.constant 0 : index
    %108 = vector.load %arg3[%c1_8, %c0_9, %c0_10] : memref<8x8x128xf32, #tpu.memory_space<vmem>>, vector<1x8x128xf32>
    %109 = vector.shape_cast %108 : vector<1x8x128xf32> to vector<8x128xf32>
    %110 = vector.shape_cast %107 : vector<8x128xf32> to vector<1x8x128xf32>
    tpu.vector_store %arg3[%c1_8, %c0_9, %c0_10], %110 {strides = array<i32>} : memref<8x8x128xf32, #tpu.memory_space<vmem>>, vector<1x8x128xf32>,
    %c18 = arith.constant 18 : index
    %111 = memref.load %arg1[%c18] : memref<56xf32, #tpu.memory_space<smem>>
    %112 = vector.broadcast %111 : f32 to vector<8x128xf32>
    %113 = arith.mulf %112, %25 : vector<8x128xf32>
    %c50 = arith.constant 50 : index
    %114 = memref.load %arg1[%c50] : memref<56xf32, #tpu.memory_space<smem>>
    %115 = vector.broadcast %114 : f32 to vector<8x128xf32>
    %116 = arith.addf %113, %115 : vector<8x128xf32>
    %c26 = arith.constant 26 : index
    %117 = memref.load %arg1[%c26] : memref<56xf32, #tpu.memory_space<smem>>
    %118 = vector.broadcast %117 : f32 to vector<8x128xf32>
    %119 = arith.mulf %118, %36 : vector<8x128xf32>
    %120 = arith.addf %116, %119 : vector<8x128xf32>
    %c34 = arith.constant 34 : index
    %121 = memref.load %arg1[%c34] : memref<56xf32, #tpu.memory_space<smem>>
    %122 = vector.broadcast %121 : f32 to vector<8x128xf32>
    %123 = arith.mulf %122, %47 : vector<8x128xf32>
    %124 = arith.addf %120, %123 : vector<8x128xf32>
    %c42 = arith.constant 42 : index
    %125 = memref.load %arg1[%c42] : memref<56xf32, #tpu.memory_space<smem>>
    %126 = vector.broadcast %125 : f32 to vector<8x128xf32>
    %127 = arith.mulf %126, %58 : vector<8x128xf32>
    %128 = arith.addf %124, %127 : vector<8x128xf32>
    %129 = math.tanh %128 : vector<8x128xf32>
    %cst_11 = arith.constant 5.000000e-01 : f32
    %130 = vector.broadcast %cst_11 : f32 to vector<8x128xf32>
    %131 = arith.mulf %130, %129 : vector<8x128xf32>
    %cst_12 = arith.constant 5.000000e-01 : f32
    %132 = vector.broadcast %cst_12 : f32 to vector<8x128xf32>
    %133 = arith.addf %131, %132 : vector<8x128xf32>
    %c2_13 = arith.constant 2 : index
    %c0_14 = arith.constant 0 : index
    %c0_15 = arith.constant 0 : index
    %134 = vector.load %arg3[%c2_13, %c0_14, %c0_15] : memref<8x8x128xf32, #tpu.memory_space<vmem>>, vector<1x8x128xf32>
    %135 = vector.shape_cast %134 : vector<1x8x128xf32> to vector<8x128xf32>
    %136 = vector.shape_cast %133 : vector<8x128xf32> to vector<1x8x128xf32>
    tpu.vector_store %arg3[%c2_13, %c0_14, %c0_15], %136 {strides = array<i32>} : memref<8x8x128xf32, #tpu.memory_space<vmem>>, vector<1x8x128xf32>,
    %c19 = arith.constant 19 : index
    %137 = memref.load %arg1[%c19] : memref<56xf32, #tpu.memory_space<smem>>
    %138 = vector.broadcast %137 : f32 to vector<8x128xf32>
    %139 = arith.mulf %138, %25 : vector<8x128xf32>
    %c51 = arith.constant 51 : index
    %140 = memref.load %arg1[%c51] : memref<56xf32, #tpu.memory_space<smem>>
    %141 = vector.broadcast %140 : f32 to vector<8x128xf32>
    %142 = arith.addf %139, %141 : vector<8x128xf32>
    %c27 = arith.constant 27 : index
    %143 = memref.load %arg1[%c27] : memref<56xf32, #tpu.memory_space<smem>>
    %144 = vector.broadcast %143 : f32 to vector<8x128xf32>
    %145 = arith.mulf %144, %36 : vector<8x128xf32>
    %146 = arith.addf %142, %145 : vector<8x128xf32>
    %c35 = arith.constant 35 : index
    %147 = memref.load %arg1[%c35] : memref<56xf32, #tpu.memory_space<smem>>
    %148 = vector.broadcast %147 : f32 to vector<8x128xf32>
    %149 = arith.mulf %148, %47 : vector<8x128xf32>
    %150 = arith.addf %146, %149 : vector<8x128xf32>
    %c43 = arith.constant 43 : index
    %151 = memref.load %arg1[%c43] : memref<56xf32, #tpu.memory_space<smem>>
    %152 = vector.broadcast %151 : f32 to vector<8x128xf32>
    %153 = arith.mulf %152, %58 : vector<8x128xf32>
    %154 = arith.addf %150, %153 : vector<8x128xf32>
    %155 = math.tanh %154 : vector<8x128xf32>
    %cst_16 = arith.constant 5.000000e-01 : f32
    %156 = vector.broadcast %cst_16 : f32 to vector<8x128xf32>
    %157 = arith.mulf %156, %155 : vector<8x128xf32>
    %cst_17 = arith.constant 5.000000e-01 : f32
    %158 = vector.broadcast %cst_17 : f32 to vector<8x128xf32>
    %159 = arith.addf %157, %158 : vector<8x128xf32>
    %c3_18 = arith.constant 3 : index
    %c0_19 = arith.constant 0 : index
    %c0_20 = arith.constant 0 : index
    %160 = vector.load %arg3[%c3_18, %c0_19, %c0_20] : memref<8x8x128xf32, #tpu.memory_space<vmem>>, vector<1x8x128xf32>
    %161 = vector.shape_cast %160 : vector<1x8x128xf32> to vector<8x128xf32>
    %162 = vector.shape_cast %159 : vector<8x128xf32> to vector<1x8x128xf32>
    tpu.vector_store %arg3[%c3_18, %c0_19, %c0_20], %162 {strides = array<i32>} : memref<8x8x128xf32, #tpu.memory_space<vmem>>, vector<1x8x128xf32>,
    %c20 = arith.constant 20 : index
    %163 = memref.load %arg1[%c20] : memref<56xf32, #tpu.memory_space<smem>>
    %164 = vector.broadcast %163 : f32 to vector<8x128xf32>
    %165 = arith.mulf %164, %25 : vector<8x128xf32>
    %c52 = arith.constant 52 : index
    %166 = memref.load %arg1[%c52] : memref<56xf32, #tpu.memory_space<smem>>
    %167 = vector.broadcast %166 : f32 to vector<8x128xf32>
    %168 = arith.addf %165, %167 : vector<8x128xf32>
    %c28 = arith.constant 28 : index
    %169 = memref.load %arg1[%c28] : memref<56xf32, #tpu.memory_space<smem>>
    %170 = vector.broadcast %169 : f32 to vector<8x128xf32>
    %171 = arith.mulf %170, %36 : vector<8x128xf32>
    %172 = arith.addf %168, %171 : vector<8x128xf32>
    %c36 = arith.constant 36 : index
    %173 = memref.load %arg1[%c36] : memref<56xf32, #tpu.memory_space<smem>>
    %174 = vector.broadcast %173 : f32 to vector<8x128xf32>
    %175 = arith.mulf %174, %47 : vector<8x128xf32>
    %176 = arith.addf %172, %175 : vector<8x128xf32>
    %c44 = arith.constant 44 : index
    %177 = memref.load %arg1[%c44] : memref<56xf32, #tpu.memory_space<smem>>
    %178 = vector.broadcast %177 : f32 to vector<8x128xf32>
    %179 = arith.mulf %178, %58 : vector<8x128xf32>
    %180 = arith.addf %176, %179 : vector<8x128xf32>
    %181 = math.tanh %180 : vector<8x128xf32>
    %cst_21 = arith.constant 5.000000e-01 : f32
    %182 = vector.broadcast %cst_21 : f32 to vector<8x128xf32>
    %183 = arith.mulf %182, %181 : vector<8x128xf32>
    %cst_22 = arith.constant 5.000000e-01 : f32
    %184 = vector.broadcast %cst_22 : f32 to vector<8x128xf32>
    %185 = arith.addf %183, %184 : vector<8x128xf32>
    %c4_23 = arith.constant 4 : index
    %c0_24 = arith.constant 0 : index
    %c0_25 = arith.constant 0 : index
    %186 = vector.load %arg3[%c4_23, %c0_24, %c0_25] : memref<8x8x128xf32, #tpu.memory_space<vmem>>, vector<1x8x128xf32>
    %187 = vector.shape_cast %186 : vector<1x8x128xf32> to vector<8x128xf32>
    %188 = vector.shape_cast %185 : vector<8x128xf32> to vector<1x8x128xf32>
    tpu.vector_store %arg3[%c4_23, %c0_24, %c0_25], %188 {strides = array<i32>} : memref<8x8x128xf32, #tpu.memory_space<vmem>>, vector<1x8x128xf32>,
    %c21 = arith.constant 21 : index
    %189 = memref.load %arg1[%c21] : memref<56xf32, #tpu.memory_space<smem>>
    %190 = vector.broadcast %189 : f32 to vector<8x128xf32>
    %191 = arith.mulf %190, %25 : vector<8x128xf32>
    %c53 = arith.constant 53 : index
    %192 = memref.load %arg1[%c53] : memref<56xf32, #tpu.memory_space<smem>>
    %193 = vector.broadcast %192 : f32 to vector<8x128xf32>
    %194 = arith.addf %191, %193 : vector<8x128xf32>
    %c29 = arith.constant 29 : index
    %195 = memref.load %arg1[%c29] : memref<56xf32, #tpu.memory_space<smem>>
    %196 = vector.broadcast %195 : f32 to vector<8x128xf32>
    %197 = arith.mulf %196, %36 : vector<8x128xf32>
    %198 = arith.addf %194, %197 : vector<8x128xf32>
    %c37 = arith.constant 37 : index
    %199 = memref.load %arg1[%c37] : memref<56xf32, #tpu.memory_space<smem>>
    %200 = vector.broadcast %199 : f32 to vector<8x128xf32>
    %201 = arith.mulf %200, %47 : vector<8x128xf32>
    %202 = arith.addf %198, %201 : vector<8x128xf32>
    %c45 = arith.constant 45 : index
    %203 = memref.load %arg1[%c45] : memref<56xf32, #tpu.memory_space<smem>>
    %204 = vector.broadcast %203 : f32 to vector<8x128xf32>
    %205 = arith.mulf %204, %58 : vector<8x128xf32>
    %206 = arith.addf %202, %205 : vector<8x128xf32>
    %207 = math.tanh %206 : vector<8x128xf32>
    %cst_26 = arith.constant 5.000000e-01 : f32
    %208 = vector.broadcast %cst_26 : f32 to vector<8x128xf32>
    %209 = arith.mulf %208, %207 : vector<8x128xf32>
    %cst_27 = arith.constant 5.000000e-01 : f32
    %210 = vector.broadcast %cst_27 : f32 to vector<8x128xf32>
    %211 = arith.addf %209, %210 : vector<8x128xf32>
    %c5_28 = arith.constant 5 : index
    %c0_29 = arith.constant 0 : index
    %c0_30 = arith.constant 0 : index
    %212 = vector.load %arg3[%c5_28, %c0_29, %c0_30] : memref<8x8x128xf32, #tpu.memory_space<vmem>>, vector<1x8x128xf32>
    %213 = vector.shape_cast %212 : vector<1x8x128xf32> to vector<8x128xf32>
    %214 = vector.shape_cast %211 : vector<8x128xf32> to vector<1x8x128xf32>
    tpu.vector_store %arg3[%c5_28, %c0_29, %c0_30], %214 {strides = array<i32>} : memref<8x8x128xf32, #tpu.memory_space<vmem>>, vector<1x8x128xf32>,
    %c22 = arith.constant 22 : index
    %215 = memref.load %arg1[%c22] : memref<56xf32, #tpu.memory_space<smem>>
    %216 = vector.broadcast %215 : f32 to vector<8x128xf32>
    %217 = arith.mulf %216, %25 : vector<8x128xf32>
    %c54 = arith.constant 54 : index
    %218 = memref.load %arg1[%c54] : memref<56xf32, #tpu.memory_space<smem>>
    %219 = vector.broadcast %218 : f32 to vector<8x128xf32>
    %220 = arith.addf %217, %219 : vector<8x128xf32>
    %c30 = arith.constant 30 : index
    %221 = memref.load %arg1[%c30] : memref<56xf32, #tpu.memory_space<smem>>
    %222 = vector.broadcast %221 : f32 to vector<8x128xf32>
    %223 = arith.mulf %222, %36 : vector<8x128xf32>
    %224 = arith.addf %220, %223 : vector<8x128xf32>
    %c38 = arith.constant 38 : index
    %225 = memref.load %arg1[%c38] : memref<56xf32, #tpu.memory_space<smem>>
    %226 = vector.broadcast %225 : f32 to vector<8x128xf32>
    %227 = arith.mulf %226, %47 : vector<8x128xf32>
    %228 = arith.addf %224, %227 : vector<8x128xf32>
    %c46 = arith.constant 46 : index
    %229 = memref.load %arg1[%c46] : memref<56xf32, #tpu.memory_space<smem>>
    %230 = vector.broadcast %229 : f32 to vector<8x128xf32>
    %231 = arith.mulf %230, %58 : vector<8x128xf32>
    %232 = arith.addf %228, %231 : vector<8x128xf32>
    %233 = math.tanh %232 : vector<8x128xf32>
    %cst_31 = arith.constant 5.000000e-01 : f32
    %234 = vector.broadcast %cst_31 : f32 to vector<8x128xf32>
    %235 = arith.mulf %234, %233 : vector<8x128xf32>
    %cst_32 = arith.constant 5.000000e-01 : f32
    %236 = vector.broadcast %cst_32 : f32 to vector<8x128xf32>
    %237 = arith.addf %235, %236 : vector<8x128xf32>
    %c6_33 = arith.constant 6 : index
    %c0_34 = arith.constant 0 : index
    %c0_35 = arith.constant 0 : index
    %238 = vector.load %arg3[%c6_33, %c0_34, %c0_35] : memref<8x8x128xf32, #tpu.memory_space<vmem>>, vector<1x8x128xf32>
    %239 = vector.shape_cast %238 : vector<1x8x128xf32> to vector<8x128xf32>
    %240 = vector.shape_cast %237 : vector<8x128xf32> to vector<1x8x128xf32>
    tpu.vector_store %arg3[%c6_33, %c0_34, %c0_35], %240 {strides = array<i32>} : memref<8x8x128xf32, #tpu.memory_space<vmem>>, vector<1x8x128xf32>,
    %c23 = arith.constant 23 : index
    %241 = memref.load %arg1[%c23] : memref<56xf32, #tpu.memory_space<smem>>
    %242 = vector.broadcast %241 : f32 to vector<8x128xf32>
    %243 = arith.mulf %242, %25 : vector<8x128xf32>
    %c55 = arith.constant 55 : index
    %244 = memref.load %arg1[%c55] : memref<56xf32, #tpu.memory_space<smem>>
    %245 = vector.broadcast %244 : f32 to vector<8x128xf32>
    %246 = arith.addf %243, %245 : vector<8x128xf32>
    %c31 = arith.constant 31 : index
    %247 = memref.load %arg1[%c31] : memref<56xf32, #tpu.memory_space<smem>>
    %248 = vector.broadcast %247 : f32 to vector<8x128xf32>
    %249 = arith.mulf %248, %36 : vector<8x128xf32>
    %250 = arith.addf %246, %249 : vector<8x128xf32>
    %c39 = arith.constant 39 : index
    %251 = memref.load %arg1[%c39] : memref<56xf32, #tpu.memory_space<smem>>
    %252 = vector.broadcast %251 : f32 to vector<8x128xf32>
    %253 = arith.mulf %252, %47 : vector<8x128xf32>
    %254 = arith.addf %250, %253 : vector<8x128xf32>
    %c47 = arith.constant 47 : index
    %255 = memref.load %arg1[%c47] : memref<56xf32, #tpu.memory_space<smem>>
    %256 = vector.broadcast %255 : f32 to vector<8x128xf32>
    %257 = arith.mulf %256, %58 : vector<8x128xf32>
    %258 = arith.addf %254, %257 : vector<8x128xf32>
    %259 = math.tanh %258 : vector<8x128xf32>
    %cst_36 = arith.constant 5.000000e-01 : f32
    %260 = vector.broadcast %cst_36 : f32 to vector<8x128xf32>
    %261 = arith.mulf %260, %259 : vector<8x128xf32>
    %cst_37 = arith.constant 5.000000e-01 : f32
    %262 = vector.broadcast %cst_37 : f32 to vector<8x128xf32>
    %263 = arith.addf %261, %262 : vector<8x128xf32>
    %c7_38 = arith.constant 7 : index
    %c0_39 = arith.constant 0 : index
    %c0_40 = arith.constant 0 : index
    %264 = vector.load %arg3[%c7_38, %c0_39, %c0_40] : memref<8x8x128xf32, #tpu.memory_space<vmem>>, vector<1x8x128xf32>
    %265 = vector.shape_cast %264 : vector<1x8x128xf32> to vector<8x128xf32>
    %266 = vector.shape_cast %263 : vector<8x128xf32> to vector<1x8x128xf32>
    tpu.vector_store %arg3[%c7_38, %c0_39, %c0_40], %266 {strides = array<i32>} : memref<8x8x128xf32, #tpu.memory_space<vmem>>, vector<1x8x128xf32>,
    return
  }
  func.func @transform_0(%arg0: i32) -> i32 {
    %c0_i32 = arith.constant 0 : i32
    %c0_i32_0 = arith.constant 0 : i32
    return %c0_i32 : i32
  }
  func.func @transform_1(%arg0: i32) -> (i32, i32) {
    %c0_i32 = arith.constant 0 : i32
    %c0_i32_0 = arith.constant 0 : i32
    return %arg0, %c0_i32 : i32, i32
  }
  func.func @transform_2(%arg0: i32) -> (i32, i32, i32) {
    %c0_i32 = arith.constant 0 : i32
    %c0_i32_0 = arith.constant 0 : i32
    %c0_i32_1 = arith.constant 0 : i32
    return %c0_i32, %arg0, %c0_i32_0 : i32, i32, i32
  }
}

</mosaic_0001>

<bundles_post_ra>
// kernel: _xlgen_forward_impl.1
= control target key start
LH: loop header
LB: loop body
LE: loop exit
PB: predicated region body
PF: predicated region fallthrough
CT: control target
= control target key end

     0   :  { %7 = vsyncpa [#allocation3], 0  ;;  %s720_s9 = smov 0   ;;  %s722_s10 = smov 0   ;;  %s953_s0 = inlined_call_operand.vmem [shape: f32[56], index: 0, kind: input, shape index: {}]   ;;  %s954_s1 = inlined_call_operand.vmem [shape: f32[16,128], index: 1, kind: input, shape index: {}]   ;;  %s955_s2 = inlined_call_operand.vmem [shape: f32[8,16,128], index: 2, kind: output, shape index: {}]  }
   0x1   :  { %s724_s11 = smov 0  }
   0x2 LB: > { %s733_s12 = sadd.s32 4294967295, %s702_s11   ;;  %s735_s13 = sadd.s32 1, %s702_s11   ;;  %s702_s11 = sphi %s724_s11, %s959_s11   ;;  %s698_s10 = sphi %s722_s10, %s958_s10   ;;  %s694_s9 = sphi %s720_s9, %s957_s9  }
   0x3   : > { %s64_s14 = ssub.s32 %s702_s11, %s735_s13  ;;  %s67_s15 = sadd.s32 1, %s698_s10 }
   0x4   : > { %p65_p0 = scmp.eq.s32.totalorder %s64_s14, 0  ;;  %p77_p1 = scmp.ne.s32.totalorder %s698_s10, %s694_s9 }
   0x5   : > { %p78_p2 = scmp.eq.s32.totalorder %s733_s12, 1  ;;  %p525_p3 = scmp.ge.s32.totalorder %s702_s11, 1 }
   0x6   : > { %s743_s16 = scalar_select %p65_p0, %s698_s10, %s67_s15  }
   0x7   : > { %p745_p4 = por %p78_p2, %p77_p1  ;;  %p91_p5 = scmp.lt.s32.totalorder %s702_s11, 3 }
   0x8   : > { %p606_p6 = scmp.eq.s32.totalorder %s733_s12, 0  ;;  %s103_s20 = sshll.u32 %s953_s0, 4  ;;  %s104_s20 = int_to_ptr.vmem [resolvable:$true] %s103_s20 }
   0x9   : > { %p92_p7 = pnand %p525_p3, %p91_p5  ;;  %s704_s21 = smov [#allocation2]  }
   0xb   : > { %p602_p8 = pneg %p92_p7  ;;  %123 = sbr.rel (%p92_p7) target bundleno = 108 (0x6c), region = 28 }
   0xd   : > { %p603_p9 = pnand %p606_p6, %p602_p8 }
   0xf   : > { %605 = dma.vmem_to_smem (!%p603_p9), %s104_s20, 16, %s704_s21, [#allocation3]  }
  0x10   : > { %689 = dma.done.wait (%p606_p6), [#allocation3], 16  }
  0x11   : > { %691 = vsyncadd (%p606_p6), [#allocation3], 4294967280 }
  0x12   : > { %130 = sfence }
  0x13   : > { %p145_p10 = scmp.lt.s32.totalorder %s733_s12, 1  ;;  %s150_s22 = sld [smem:[#allocation2]] }
  0x14   : > { %s532_s23 = sld [smem:[#allocation2 + $0x2]] }
  0x15   : > { %s146_s24 = scalar_select %p145_p10, %s733_s12, 1 }
  0x16   : > { %s533_s25 = sld [smem:[#allocation2 + $0x1]] }
  0x17   : > { %s531_s26 = sshll.u32 %s146_s24, 3  ;;  %s534_s27 = sld [smem:[#allocation2 + $0x3]] }
  0x18   : > { %s148_s30 = scalar_lea.vmem %s954_s1, %s531_s26  ;;  %s758_s3 = sld [smem:[#allocation2 + $0x4]] }
  0x19   : > { %v149_v0 = vld [vmem:[%s148_s30] sm:$0xff]  ;;  %v151_v1 = vstv %s150_s22  ;;  %s760_s4 = sld [smem:[#allocation2 + $0xc]] }
  0x1a   : > { %v152_v2 = vmul.f32 %v151_v1, %v149_v0  ;;  %v154_v3 = vstv %s532_s23  ;;  %s762_s5 = sld [smem:[#allocation2 + $0x8]] }
  0x1b   : > { %s538_s6 = sld [smem:[#allocation2 + $0x5]] }
  0x1c   : > { %v155_v4 = vadd.f32 %v154_v3, %v152_v2  ;;  %v158_v5 = vstv %s533_s25  ;;  %s764_s7 = sld [smem:[#allocation2 + $0xd]] }
  0x1d   : > { %v159_v6 = vmul.f32 %v158_v5, %v149_v0  ;;  %v161_v7 = vstv %s534_s27  ;;  %s766_s8 = sld [smem:[#allocation2 + $0x9]] }
  0x1e   : > { %633 = vtanh.f32 %v155_v4  ;;  %s541_s11 = sld [smem:[#allocation2 + $0x6]]  ;;  %v165_v9 = vstv %s758_s3 }
  0x1f   : > { %v162_v8 = vadd.f32 %v161_v7, %v159_v6  ;;  %s542_s14 = sld [smem:[#allocation2 + $0xe]]  ;;  %v168_v11 = vstv %s760_s4 }
  0x20   : > { %s543_s15 = sld [smem:[#allocation2 + $0xa]]  ;;  %v171_v13 = vstv %s762_s5 }
  0x21   : > { %635 = vtanh.f32 %v162_v8  ;;  %s544_s18 = sld [smem:[#allocation2 + $0x7]]  ;;  %v176_v10 = vstv %s538_s6 }
  0x22   : > { %s769_s19 = sld [smem:[#allocation2 + $0xf]]  ;;  %v179_v14 = vstv %s764_s7 }
  0x23   : > { %s772_s20 = sld [smem:[#allocation2 + $0xb]]  ;;  %v182_v15 = vstv %s766_s8 }
  0x24   : > { %v634_v12 = vpop.eup %633  ;;  %v187_v16 = vstv %s541_s11  ;;  %s777_s21 = sld [smem:[#allocation2 + $0x10]] }
  0x25   : > { %v166_v17 = vmul.f32 %v634_v12, %v165_v9  ;;  %v177_v18 = vmul.f32 %v634_v12, %v176_v10  ;;  %v188_v19 = vmul.f32 %v634_v12, %v187_v16  ;;  %v190_v20 = vstv %s542_s14  ;;  %s779_s22 = sld [smem:[#allocation2 + $0x30]] }
  0x26   : > { %v193_v21 = vstv %s543_s15  ;;  %s781_s23 = sld [smem:[#allocation2 + $0x18]] }
  0x27   : > { %v636_v22 = vpop.eup %635  ;;  %v169_v23 = vadd.f32 %v168_v11, %v166_v17  ;;  %v180_v24 = vadd.f32 %v179_v14, %v177_v18  ;;  %v191_v25 = vadd.f32 %v190_v20, %v188_v19  ;;  %v198_v26 = vstv %s544_s18  ;;  %s783_s24 = sld [smem:[#allocation2 + $0x20]] }
  0x28   : > { %v172_v27 = vmul.f32 %v636_v22, %v171_v13  ;;  %v183_v28 = vmul.f32 %v636_v22, %v182_v15  ;;  %v194_v29 = vmul.f32 %v636_v22, %v193_v21  ;;  %v199_v30 = vmul.f32 %v634_v12, %v198_v26  ;;  %s785_s25 = sld [smem:[#allocation2 + $0x28]] }
  0x29   : > { %v201_v31 = vstv %s769_s19  ;;  %v204_v32 = vstv %s772_s20  ;;  %s789_s26 = sld [smem:[#allocation2 + $0x11]] }
  0x2a   : > { %v173_v33 = vadd.f32 %v172_v27, %v169_v23  ;;  %v184_v34 = vadd.f32 %v183_v28, %v180_v24  ;;  %v195_v35 = vadd.f32 %v194_v29, %v191_v25  ;;  %v202_v36 = vadd.f32 %v201_v31, %v199_v30  ;;  %s791_s27 = sld [smem:[#allocation2 + $0x31]] }
  0x2b   : > { %v205_v37 = vmul.f32 %v636_v22, %v204_v32  ;;  %s554_s28 = sld [smem:[#allocation2 + $0x19]]  ;;  %v209_v39 = vstv %s777_s21  ;;  %v212_v44 = vstv %s779_s22 }
  0x2c   : > { %637 = vtanh.f32 %v173_v33  ;;  %s793_s29 = sld [smem:[#allocation2 + $0x21]]  ;;  %v215_v41 = vstv %s781_s23 }
  0x2d   : > { %639 = vtanh.f32 %v184_v34  ;;  %v206_v38 = vadd.f32 %v205_v37, %v202_v36  ;;  %s795_s30 = sld [smem:[#allocation2 + $0x29]]  ;;  %v219_v45 = vstv %s783_s24 }
  0x2e   : > { %641 = vtanh.f32 %v195_v35  ;;  %s797_s3 = sld [smem:[#allocation2 + $0x12]]  ;;  %v223_v50 = vstv %s785_s25 }
  0x2f   : > { %643 = vtanh.f32 %v206_v38  ;;  %s799_s4 = sld [smem:[#allocation2 + $0x32]]  ;;  %v231_v40 = vstv %s789_s26  ;;  %s142_s26 = sand.u32 1, %s694_s9  }
  0x30   : > { %s803_s5 = sld [smem:[#allocation2 + $0x1a]]  ;;  %v234_v46 = vstv %s791_s27 }
  0x31   : > { %v237_v42 = vstv %s554_s28  ;;  %s806_s6 = sld [smem:[#allocation2 + $0x22]] }
  0x32   : > { %v808_v43 = vpop.eup %637  ;;  %v241_v47 = vstv %s793_s29  ;;  %s814_s7 = sld [smem:[#allocation2 + $0x2a]] }
  0x33   : > { %v816_v48 = vpop.eup %639  ;;  %v210_v49 = vmul.f32 %v808_v43, %v209_v39  ;;  %v232_v51 = vmul.f32 %v808_v43, %v231_v40  ;;  %v245_v52 = vstv %s795_s30  ;;  %s822_s8 = sld [smem:[#allocation2 + $0x13]]  ;;  %s876_s30 = sshll.u32 %s142_s26, 6 }
  0x34   : > { %v824_v53 = vpop.eup %641  ;;  %v216_v54 = vmul.f32 %v816_v48, %v215_v41  ;;  %v238_v55 = vmul.f32 %v816_v48, %v237_v42  ;;  %v254_v56 = vstv %s797_s3  ;;  %s829_s11 = sld [smem:[#allocation2 + $0x33]] }
  0x35   : > { %v831_v57 = vpop.eup %643  ;;  %v213_v58 = vadd.f32 %v212_v44, %v210_v49  ;;  %v220_v59 = vmul.f32 %v824_v53, %v219_v45  ;;  %v235_v60 = vadd.f32 %v234_v46, %v232_v51  ;;  %v242_v61 = vmul.f32 %v824_v53, %v241_v47  ;;  %s835_s14 = sld [smem:[#allocation2 + $0x1b]] }
  0x36   : > { %v224_v62 = vmul.f32 %v831_v57, %v223_v50  ;;  %v246_v63 = vmul.f32 %v831_v57, %v245_v52  ;;  %v255_v0 = vmul.f32 %v808_v43, %v254_v56  ;;  %v257_v1 = vstv %s799_s4  ;;  %s567_s15 = sld [smem:[#allocation2 + $0x23]] }
  0x37   : > { %v217_v2 = vadd.f32 %v216_v54, %v213_v58  ;;  %v239_v3 = vadd.f32 %v238_v55, %v235_v60  ;;  %v260_v4 = vstv %s803_s5  ;;  %v264_v5 = vstv %s806_s6  ;;  %s843_s18 = sld [smem:[#allocation2 + $0x2b]] }
  0x38   : > { %v258_v6 = vadd.f32 %v257_v1, %v255_v0  ;;  %v261_v7 = vmul.f32 %v816_v48, %v260_v4  ;;  %v265_v8 = vmul.f32 %v824_v53, %v264_v5  ;;  %v268_v9 = vstv %s814_s7  ;;  %s848_s19 = sld [smem:[#allocation2 + $0x14]] }
  0x39   : > { %v221_v10 = vadd.f32 %v220_v59, %v217_v2  ;;  %v243_v11 = vadd.f32 %v242_v61, %v239_v3  ;;  %v277_v12 = vstv %s822_s8  ;;  %s851_s20 = sld [smem:[#allocation2 + $0x34]]  ;;  %v269_v14 = vmul.f32 %v831_v57, %v268_v9  ;;  %s900_s8 = scalar_lea.vmem [#allocation4], %s876_s30 }
  0x3a   : > { %v262_v13 = vadd.f32 %v261_v7, %v258_v6  ;;  %v278_v15 = vmul.f32 %v808_v43, %v277_v12  ;;  %v280_v16 = vstv %s829_s11  ;;  %s572_s21 = sld [smem:[#allocation2 + $0x1c]] }
  0x3b   : > { %v225_v17 = vadd.f32 %v224_v62, %v221_v10  ;;  %v247_v18 = vadd.f32 %v246_v63, %v243_v11  ;;  %v283_v19 = vstv %s835_s14  ;;  %s573_s22 = sld [smem:[#allocation2 + $0x24]] }
  0x3c   : > { %v266_v20 = vadd.f32 %v265_v8, %v262_v13  ;;  %v281_v21 = vadd.f32 %v280_v16, %v278_v15  ;;  %v284_v22 = vmul.f32 %v816_v48, %v283_v19  ;;  %v287_v23 = vstv %s567_s15  ;;  %s574_s23 = sld [smem:[#allocation2 + $0x2c]] }
  0x3d   : > { %645 = vtanh.f32 %v225_v17  ;;  %v288_v24 = vmul.f32 %v824_v53, %v287_v23  ;;  %v291_v25 = vstv %s843_s18  ;;  %s860_s24 = sld [smem:[#allocation2 + $0x15]] }
  0x3e   : > { %647 = vtanh.f32 %v247_v18  ;;  %v270_v26 = vadd.f32 %v269_v14, %v266_v20  ;;  %v285_v27 = vadd.f32 %v284_v22, %v281_v21  ;;  %v292_v28 = vmul.f32 %v831_v57, %v291_v25  ;;  %s863_s25 = sld [smem:[#allocation2 + $0x35]] }
  0x3f   : > { %v300_v29 = vstv %s848_s19  ;;  %v303_v30 = vstv %s851_s20  ;;  %s868_s27 = sld [smem:[#allocation2 + $0x1d]]  ;;  %s595_s19 = sshll.u32 (%p745_p4), %s733_s12, 3 }
  0x40   : > { %649 = vtanh.f32 %v270_v26  ;;  %v289_v31 = vadd.f32 %v288_v24, %v285_v27  ;;  %v301_v32 = vmul.f32 %v808_v43, %v300_v29  ;;  %v306_v33 = vstv %s572_s21  ;;  %s871_s28 = sld [smem:[#allocation2 + $0x25]] }
  0x41   : > { %v307_v34 = vmul.f32 %v816_v48, %v306_v33  ;;  %v310_v35 = vstv %s573_s22  ;;  %s874_s29 = sld [smem:[#allocation2 + $0x2d]]  ;;  %s399_s22 = scalar_lea.vmem (%p745_p4), %s955_s2, %s595_s19 }
  0x42   : > { %v293_v36 = vadd.f32 %v292_v28, %v289_v31  ;;  %v304_v37 = vadd.f32 %v303_v30, %v301_v32  ;;  %v311_v38 = vmul.f32 %v824_v53, %v310_v35  ;;  %v314_v39 = vstv %s574_s23  ;;  %s879_s9 = sld [smem:[#allocation2 + $0x16]] }
  0x43   : > { %v646_v40 = vpop.eup %645  ;;  %v315_v41 = vmul.f32 %v831_v57, %v314_v39  ;;  %v323_v42 = vstv %s860_s24  ;;  %s883_s3 = sld [smem:[#allocation2 + $0x36]] }
  0x44   : > { %v648_v44 = vpop.eup %647  ;;  %v227_v45 = vmul.f32 0.5, %v646_v40  ;;  %651 = vtanh.f32 %v293_v36  ;;  %v308_v46 = vadd.f32 %v307_v34, %v304_v37  ;;  %v324_v47 = vmul.f32 %v808_v43, %v323_v42  ;;  %s886_s4 = sld [smem:[#allocation2 + $0x1e]] }
  0x45   : > { %v249_v49 = vmul.f32 0.5, %v648_v44  ;;  %v326_v50 = vstv %s863_s25  ;;  %v329_v51 = vstv %s868_s27  ;;  %s890_s5 = sld [smem:[#allocation2 + $0x26]] }
  0x46   : > { %v650_v52 = vpop.eup %649  ;;  %v228_v54 = vadd.f32 0.5, %v227_v45  ;;  %v312_v55 = vadd.f32 %v311_v38, %v308_v46  ;;  %v327_v56 = vadd.f32 %v326_v50, %v324_v47  ;;  %v330_v58 = vmul.f32 %v816_v48, %v329_v51  ;;  %s893_s6 = sld [smem:[#allocation2 + $0x2e]] }
  0x47   : > { %v250_v59 = vadd.f32 0.5, %v249_v49  ;;  %v272_v60 = vmul.f32 0.5, %v650_v52  ;;  %v333_v61 = vstv %s871_s28  ;;  %v337_v62 = vstv %s874_s29  ;;  %s897_s7 = sld [smem:[#allocation2 + $0x17]] }
  0x48   : > { %229 = vst [vmem:[%s900_s8] sm:$0xff] %v228_v54  ;;  %v316_v63 = vadd.f32 %v315_v41, %v312_v55  ;;  %v331_v0 = vadd.f32 %v330_v58, %v327_v56  ;;  %v334_v1 = vmul.f32 %v824_v53, %v333_v61  ;;  %v338_v2 = vmul.f32 %v831_v57, %v337_v62  ;;  %s905_s11 = sld [smem:[#allocation2 + $0x37]] }
  0x49   : > { %557 = vst [vmem:[%s900_s8 + $0x8] sm:$0xff] %v250_v59  ;;  %v273_v3 = vadd.f32 0.5, %v272_v60  ;;  %v346_v4 = vstv %s879_s9  ;;  %v349_v5 = vstv %s883_s3  ;;  %s590_s14 = sld [smem:[#allocation2 + $0x1f]] }
  0x4a   : > { %v652_v6 = vpop.eup %651  ;;  %653 = vtanh.f32 %v316_v63  ;;  %v335_v7 = vadd.f32 %v334_v1, %v331_v0  ;;  %v347_v8 = vmul.f32 %v808_v43, %v346_v4  ;;  %v352_v9 = vstv %s886_s4  ;;  %s591_s15 = sld [smem:[#allocation2 + $0x27]] }
  0x4b   : > { %563 = vst [vmem:[%s900_s8 + $0x10] sm:$0xff] %v273_v3  ;;  %v295_v10 = vmul.f32 0.5, %v652_v6  ;;  %v353_v11 = vmul.f32 %v816_v48, %v352_v9  ;;  %v356_v12 = vstv %s890_s5  ;;  %s592_s18 = sld [smem:[#allocation2 + $0x2f]] }
  0x4c   : > { %v339_v13 = vadd.f32 %v338_v2, %v335_v7  ;;  %v350_v14 = vadd.f32 %v349_v5, %v347_v8  ;;  %v357_v15 = vmul.f32 %v824_v53, %v356_v12  ;;  %v360_v16 = vstv %s893_s6 }
  0x4d   : > { %v296_v17 = vadd.f32 0.5, %v295_v10  ;;  %v361_v18 = vmul.f32 %v831_v57, %v360_v16  ;;  %v369_v19 = vstv %s897_s7 }
  0x4e   : > { %655 = vtanh.f32 %v339_v13  ;;  %v354_v20 = vadd.f32 %v353_v11, %v350_v14  ;;  %v370_v21 = vmul.f32 %v808_v43, %v369_v19  ;;  %v372_v22 = vstv %s905_s11 }
  0x4f   : > { %569 = vst [vmem:[%s900_s8 + $0x18] sm:$0xff] %v296_v17  ;;  %v375_v23 = vstv %s590_s14 }
  0x50   : > { %v654_v24 = vpop.eup %653  ;;  %v358_v25 = vadd.f32 %v357_v15, %v354_v20  ;;  %v373_v26 = vadd.f32 %v372_v22, %v370_v21  ;;  %v376_v27 = vmul.f32 %v816_v48, %v375_v23  ;;  %v379_v28 = vstv %s591_s15  ;;  %v444_v45 = vld [vmem:[%s900_s8 + $0x8] sm:$0xff] (%p745_p4) }
  0x51   : > { %v318_v29 = vmul.f32 0.5, %v654_v24  ;;  %v380_v30 = vmul.f32 %v824_v53, %v379_v28  ;;  %v383_v31 = vstv %s592_s18  ;;  %445 = vst [vmem:[%s399_s22 + $0x10] sm:$0xff] (%p745_p4), %v444_v45 }
  0x52   : > { %v362_v32 = vadd.f32 %v361_v18, %v358_v25  ;;  %v377_v33 = vadd.f32 %v376_v27, %v373_v26  ;;  %v384_v43 = vmul.f32 %v831_v57, %v383_v31  ;;  %v442_v57 = vld [vmem:[%s900_s8] sm:$0xff] (%p745_p4)  ;;  %v446_v46 = vld [vmem:[%s900_s8 + $0x10] sm:$0xff] (%p745_p4) }
  0x53   : > { %v319_v34 = vadd.f32 0.5, %v318_v29  ;;  %443 = vst [vmem:[%s399_s22] sm:$0xff] (%p745_p4), %v442_v57 }
  0x54   : > { %v656_v35 = vpop.eup %655  ;;  %657 = vtanh.f32 %v362_v32  ;;  %v381_v36 = vadd.f32 %v380_v30, %v377_v33  ;;  %447 = vst [vmem:[%s399_s22 + $0x20] sm:$0xff] (%p745_p4), %v446_v46 }
  0x55   : > { %575 = vst [vmem:[%s900_s8 + $0x20] sm:$0xff] %v319_v34  ;;  %v341_v37 = vmul.f32 0.5, %v656_v35 }
  0x56   : > { %v385_v38 = vadd.f32 %v384_v43, %v381_v36  ;;  %v448_v47 = vld [vmem:[%s900_s8 + $0x18] sm:$0xff] (%p745_p4) }
  0x57   : > { %v342_v48 = vadd.f32 0.5, %v341_v37  ;;  %449 = vst [vmem:[%s399_s22 + $0x30] sm:$0xff] (%p745_p4), %v448_v47 }
  0x58   : > { %659 = vtanh.f32 %v385_v38 }
  0x59   : > { %581 = vst [vmem:[%s900_s8 + $0x28] sm:$0xff] %v342_v48 }
  0x5a   : > { %v658_v39 = vpop.eup %657 }
  0x5b   : > { %v364_v40 = vmul.f32 0.5, %v658_v39 }
  0x5c   : > { %v450_v49 = vld [vmem:[%s900_s8 + $0x20] sm:$0xff] (%p745_p4) }
  0x5d   : > { %v365_v53 = vadd.f32 0.5, %v364_v40  ;;  %451 = vst [vmem:[%s399_s22 + $0x40] sm:$0xff] (%p745_p4), %v450_v49 }
  0x5e   : > { %v660_v41 = vpop.eup %659 }
  0x5f   : > { %587 = vst [vmem:[%s900_s8 + $0x30] sm:$0xff] %v365_v53  ;;  %v387_v42 = vmul.f32 0.5, %v660_v41  ;;  %397 = sbr.rel (!%p745_p4) target bundleno = 108 (0x6c), region = 36 }
  0x60   : > { %v452_v50 = vld [vmem:[%s900_s8 + $0x28] sm:$0xff] (%p745_p4) }
  0x61   : > { %v388_v44 = vadd.f32 0.5, %v387_v42  ;;  %453 = vst [vmem:[%s399_s22 + $0x50] sm:$0xff] (%p745_p4), %v452_v50 }
  0x63   : > { %593 = vst [vmem:[%s900_s8 + $0x38] sm:$0xff] %v388_v44 }
  0x66   : > { %v454_v51 = vld [vmem:[%s900_s8 + $0x30] sm:$0xff] }
  0x67   : > { %455 = vst [vmem:[%s399_s22 + $0x60] sm:$0xff] %v454_v51 }
  0x6a   : > { %v456_v52 = vld [vmem:[%s900_s8 + $0x38] sm:$0xff] }
  0x6b   : > { %457 = vst [vmem:[%s399_s22 + $0x70] sm:$0xff] %v456_v52 }
  0x6c PF: > { %p10_p11 = scmp.ge.s32.totalorder %s735_s13, 4   ;;  %s957_s9 = smov %s698_s10 }
  0x6d   : > { %s958_s10 = smov %s743_s16  ;;  %s959_s11 = smov %s735_s13 }
  0x6e   :  { %12 = sbr.rel (!%p10_p11) target bundleno = 2 (0x2), region = 108 }
  0x73   :  { %473 = vsyncpa [#allocation3], 1 }
  0x74   :  { %475 = vsyncpa [#allocation3 + $0x1], 1 }

</bundles_post_ra>
